<compile_context>
chip_gen: v7x
topology: tpu7x:2x2x1
jax: 0.10.0
libtpu: 0.0.40
codegen_flags: <defaults>
</compile_context>

<pallas_src>
import functools

import jax
import jax.numpy as jnp
from jax import lax
from jax.experimental import pallas as pl
from jax.experimental.pallas import tpu as pltpu


def _focal_modulator(one_minus_pt, gamma):
    """(1 - pt)**gamma specialized on the static Python float `gamma`."""
    g = float(gamma)
    if g == 0.0:
        return None                         # factor == 1 -> drop it entirely
    if g.is_integer() and 1.0 <= g <= 8.0:
        f = one_minus_pt
        for _ in range(int(g) - 1):
            f = f * one_minus_pt            # pure VPU multiplies, no EUP
        return f
    return jnp.power(one_minus_pt, g)       # general non-integer gamma


def _focal_loss_kernel(pred_ref, label_ref, out_ref, *, alpha, gamma,
                       n_total, block_rows):
    i = pl.program_id(0)

    pred = pred_ref[...].astype(jnp.float32)       # (TN, C), bf16 upcast here
    labels = label_ref[...]                        # (TN, 1) int32
    tn, c = pred.shape

    # log_softmax along the class (lane) axis, gather fused before LSE subtract
    row_max = jnp.max(pred, axis=-1, keepdims=True)
    shifted = pred - row_max
    lse = jnp.log(jnp.sum(jnp.exp(shifted), axis=-1, keepdims=True))   # (TN,1)

    lane_iota = lax.broadcasted_iota(jnp.int32, (tn, c), 1)
    picked = jnp.sum(jnp.where(lane_iota == labels, shifted, 0.0),
                     axis=-1, keepdims=True)                           # (TN,1)
    logpt = picked - lse                                               # (TN,1)

    pt = jnp.exp(logpt)
    mod = _focal_modulator(1.0 - pt, gamma)
    loss = (-alpha) * logpt if mod is None else (-alpha) * mod * logpt

    # Mask rows that are padding of the last (ragged) tile.
    row_iota = lax.broadcasted_iota(jnp.int32, (tn, 1), 0)
    valid = (i * block_rows + row_iota) < n_total
    loss = jnp.where(valid, loss, 0.0)

    partial = jnp.sum(loss)                                            # scalar
    out_ref[...] = jnp.broadcast_to(partial, out_ref.shape).astype(out_ref.dtype)


def _pick_block_rows(n, c, itemsize, target_bytes=4 << 20):
    """Rows per tile ~= target_bytes of logits; multiple of 8; capped at 2048."""
    tn = (target_bytes // max(c * itemsize, 1)) // 8 * 8
    tn = int(max(8, min(tn, 2048)))
    return n if tn >= n else tn


def focal_loss_from_labels(y_pred, labels, *, alpha, gamma=0.0,
                           size_average=True, block_rows=None):
    """Focal loss from (N, C) logits (f32 or bf16) and int class labels (N,)."""
    assert y_pred.ndim == 2
    n, c = y_pred.shape
    assert labels.shape == (n,)

    itemsize = jnp.dtype(y_pred.dtype).itemsize
    tn = _pick_block_rows(n, c, itemsize) if block_rows is None else int(block_rows)
    if tn >= n:
        tn = n
    else:
        assert tn % 8 == 0, "block_rows must be a multiple of 8 (sublane tiling)"
    grid = pl.cdiv(n, tn)

    labels2d = labels.astype(jnp.int32).reshape(n, 1)

    # Double-buffered pred + label tiles (+ headroom); with the default ~4 MiB
    # tile target this stays well under every generation's VMEM (incl. v7x).
    need = 2 * (tn * c * itemsize + tn * 4 + 128 * 4)
    vmem_limit = int(min(max(2 * need + (4 << 20), 16 << 20), 64 << 20))

    kernel = functools.partial(
        _focal_loss_kernel, alpha=float(alpha), gamma=float(gamma),
        n_total=n, block_rows=tn)

    partials = pl.pallas_call(
        kernel,
        out_shape=jax.ShapeDtypeStruct((grid, 1, 128), jnp.float32),
        grid=(grid,),
        in_specs=[
            pl.BlockSpec((tn, c), lambda i: (i, 0)),      # logits tile
            pl.BlockSpec((tn, 1), lambda i: (i, 0)),      # int32 labels tile
        ],
        out_specs=pl.BlockSpec((1, 1, 128), lambda i: (i, 0, 0)),
        compiler_params=pltpu.CompilerParams(
            dimension_semantics=("parallel",),
            vmem_limit_bytes=vmem_limit),
    )(y_pred, labels2d)

    total = jnp.sum(partials[:, 0, 0])
    return total / n if size_average else total


def focal_loss(y_pred, y_true, *, alpha, gamma=0.0, size_average=True,
               block_rows=None):
    """Drop-in for FocalLoss.forward: y_true is dense (N, C) one-hot / scores."""
    assert y_pred.ndim == 2 and y_pred.shape == y_true.shape
    # torch.argmax returns the first maximal index on ties; jnp.argmax matches.
    labels = jnp.argmax(y_true, axis=-1).astype(jnp.int32)
    return focal_loss_from_labels(y_pred, labels, alpha=alpha, gamma=gamma,
                                  size_average=size_average,
                                  block_rows=block_rows)


if __name__ == "__main__":
    def ref_focal(y_pred, y_true, alpha, gamma, size_average):
        logp = jax.nn.log_softmax(y_pred.astype(jnp.float32), axis=-1)
        idx = jnp.argmax(y_true, axis=-1)
        logpt = jnp.take_along_axis(logp, idx[:, None], axis=1)
        pt = jnp.exp(logpt)
        loss = -alpha * (1.0 - pt) ** gamma * logpt
        return jnp.mean(loss) if size_average else jnp.sum(loss)

    key = jax.random.PRNGKey(0)
    k1, k2, k3, k4 = jax.random.split(key, 4)
    alpha, gamma = 0.25, 2.0

    # Test 1: single tile, lane-dense C, mean reduction.
    N, C = 64, 128
    y_pred = jax.random.normal(k1, (N, C), dtype=jnp.float32)
    y_true = jax.nn.one_hot(jax.random.randint(k2, (N,), 0, C), C,
                            dtype=jnp.float32)
    out = focal_loss(y_pred, y_true, alpha=alpha, gamma=gamma, size_average=True)
    jax.block_until_ready(out)
    ref = ref_focal(y_pred, y_true, alpha, gamma, True)
    assert jnp.allclose(out, ref, rtol=1e-5, atol=1e-6), (out, ref)

    # Test 2: multi-tile grid with ragged last tile (row masking) + sum mode.
    N2, C2 = 40, 128
    y_pred2 = jax.random.normal(k3, (N2, C2), dtype=jnp.float32)
    y_true2 = jax.nn.one_hot(jax.random.randint(k4, (N2,), 0, C2), C2,
                             dtype=jnp.float32)
    out2 = focal_loss(y_pred2, y_true2, alpha=alpha, gamma=gamma,
                      size_average=False, block_rows=16)
    jax.block_until_ready(out2)
    ref2 = ref_focal(y_pred2, y_true2, alpha, gamma, False)
    assert jnp.allclose(out2, ref2, rtol=1e-5, atol=1e-5), (out2, ref2)

    # Test 3: bf16 logits straight from HBM (kernel upcasts in-register).
    y_pred_bf16 = y_pred.astype(jnp.bfloat16)
    out3 = focal_loss(y_pred_bf16, y_true, alpha=alpha, gamma=gamma,
                      size_average=True)
    jax.block_until_ready(out3)
    ref3 = ref_focal(y_pred_bf16, y_true, alpha, gamma, True)
    assert jnp.allclose(out3, ref3, rtol=1e-4, atol=1e-5), (out3, ref3)

    print("KERNEL_OK")
</pallas_src>

<mosaic_0001>
module attributes {stable_mosaic.version = 11 : i64} {
  func.func @_focal_loss_kernel(%arg0: i32, %arg1: memref<64x128xf32, #tpu.memory_space<vmem>>, %arg2: memref<64x1xi32, #tpu.memory_space<vmem>>, %arg3: memref<1x1x128xf32, #tpu.memory_space<vmem>>) attributes {dimension_semantics = [#tpu.dimension_semantics<parallel>], iteration_bounds = array<i64: 1>, scalar_prefetch = 0 : i64, scratch_operands = 0 : i64, tpu.core_type = #tpu.core_type<tc>, window_params = [{transform_indices = @transform_0, window_bounds = array<i64: 64, 128>}, {transform_indices = @transform_1, window_bounds = array<i64: 64, 1>}, {transform_indices = @transform_2, window_bounds = array<i64: 1, 1, 128>}]} {
    %c0 = arith.constant 0 : index
    %c0_0 = arith.constant 0 : index
    %0 = vector.load %arg1[%c0, %c0_0] : memref<64x128xf32, #tpu.memory_space<vmem>>, vector<64x128xf32>
    %c0_1 = arith.constant 0 : index
    %c0_2 = arith.constant 0 : index
    %1 = vector.load %arg2[%c0_1, %c0_2] : memref<64x1xi32, #tpu.memory_space<vmem>>, vector<64x1xi32>
    %cst = arith.constant dense<0xFF800000> : vector<64xf32>
    %2 = vector.multi_reduction <maximumf>, %0, %cst [1] : vector<64x128xf32> to vector<64xf32>
    %3 = vector.shape_cast %2 : vector<64xf32> to vector<64x1xf32>
    %4 = vector.broadcast %3 : vector<64x1xf32> to vector<64x128xf32>
    %5 = arith.subf %0, %4 : vector<64x128xf32>
    %6 = math.exp %5 : vector<64x128xf32>
    %cst_3 = arith.constant dense<0.000000e+00> : vector<64xf32>
    %7 = vector.multi_reduction <add>, %6, %cst_3 [1] : vector<64x128xf32> to vector<64xf32>
    %8 = vector.shape_cast %7 : vector<64xf32> to vector<64x1xf32>
    %9 = math.log %8 : vector<64x1xf32>
    %10 = tpu.iota {dimensions = array<i32: 1>} : vector<64x128xi32>
    %11 = vector.broadcast %1 : vector<64x1xi32> to vector<64x128xi32>
    %12 = arith.cmpi eq, %10, %11 : vector<64x128xi32>
    %cst_4 = arith.constant 0.000000e+00 : f32
    %13 = vector.broadcast %cst_4 : f32 to vector<64x128xf32>
    %14 = arith.select %12, %5, %13 : vector<64x128xi1>, vector<64x128xf32>
    %cst_5 = arith.constant dense<0.000000e+00> : vector<64xf32>
    %15 = vector.multi_reduction <add>, %14, %cst_5 [1] : vector<64x128xf32> to vector<64xf32>
    %16 = vector.shape_cast %15 : vector<64xf32> to vector<64x1xf32>
    %17 = arith.subf %16, %9 : vector<64x1xf32>
    %18 = math.exp %17 : vector<64x1xf32>
    %cst_6 = arith.constant 1.000000e+00 : f32
    %19 = vector.broadcast %cst_6 : f32 to vector<64x1xf32>
    %20 = arith.subf %19, %18 : vector<64x1xf32>
    %21 = arith.mulf %20, %20 : vector<64x1xf32>
    %cst_7 = arith.constant -2.500000e-01 : f32
    %22 = vector.broadcast %cst_7 : f32 to vector<64x1xf32>
    %23 = arith.mulf %22, %21 : vector<64x1xf32>
    %24 = arith.mulf %23, %17 : vector<64x1xf32>
    %25 = tpu.iota {dimensions = array<i32: 0>} : vector<64x1xi32>
    %c64_i32 = arith.constant 64 : i32
    %26 = arith.muli %arg0, %c64_i32 : i32
    %27 = vector.broadcast %26 : i32 to vector<64x1xi32>
    %28 = arith.addi %27, %25 : vector<64x1xi32>
    %c64_i32_8 = arith.constant 64 : i32
    %29 = vector.broadcast %c64_i32_8 : i32 to vector<64x1xi32>
    %30 = arith.cmpi slt, %28, %29 : vector<64x1xi32>
    %cst_9 = arith.constant 0.000000e+00 : f32
    %31 = vector.broadcast %cst_9 : f32 to vector<64x1xf32>
    %32 = arith.select %30, %24, %31 : vector<64x1xi1>, vector<64x1xf32>
    %33 = vector.shape_cast %32 : vector<64x1xf32> to vector<1x64x1xf32>
    %cst_10 = arith.constant dense<0.000000e+00> : vector<1xf32>
    %34 = vector.multi_reduction <add>, %33, %cst_10 [1, 2] : vector<1x64x1xf32> to vector<1xf32>
    %35 = vector.shape_cast %34 : vector<1xf32> to vector<1x1x1xf32>
    %36 = vector.extract %35[0, 0, 0] : f32 from vector<1x1x1xf32>
    %37 = vector.broadcast %36 : f32 to vector<1x1x128xf32>
    %c0_11 = arith.constant 0 : index
    %c0_12 = arith.constant 0 : index
    %c0_13 = arith.constant 0 : index
    %38 = vector.load %arg3[%c0_11, %c0_12, %c0_13] : memref<1x1x128xf32, #tpu.memory_space<vmem>>, vector<1x1x128xf32>
    tpu.vector_store %arg3[%c0_11, %c0_12, %c0_13], %37 {strides = array<i32>} : memref<1x1x128xf32, #tpu.memory_space<vmem>>, vector<1x1x128xf32>,
    return
  }
  func.func @transform_0(%arg0: i32) -> (i32, i32) {
    %c0_i32 = arith.constant 0 : i32
    %c0_i32_0 = arith.constant 0 : i32
    return %arg0, %c0_i32 : i32, i32
  }
  func.func @transform_1(%arg0: i32) -> (i32, i32) {
    %c0_i32 = arith.constant 0 : i32
    %c0_i32_0 = arith.constant 0 : i32
    return %arg0, %c0_i32 : i32, i32
  }
  func.func @transform_2(%arg0: i32) -> (i32, i32, i32) {
    %c0_i32 = arith.constant 0 : i32
    %c0_i32_0 = arith.constant 0 : i32
    %c0_i32_1 = arith.constant 0 : i32
    return %arg0, %c0_i32, %c0_i32_0 : i32, i32, i32
  }
}

</mosaic_0001>

<bundles_post_ra>
// kernel: tpu_custom_call.1
= control target key start
LH: loop header
LB: loop body
LE: loop exit
PB: predicated region body
PF: predicated region fallthrough
CT: control target
= control target key end

     0   :  { %v368_v4 = vmov 0   ;;  %s461_s0 = inlined_call_operand.vmem [shape: f32[64,128], index: 0, kind: input, shape index: {}]   ;;  %s462_s1 = inlined_call_operand.vmem [shape: s32[64,1], index: 1, kind: input, shape index: {}]   ;;  %s463_s2 = inlined_call_operand.hbm [shape: f32[1,1,128], index: 2, kind: output, shape index: {}]  }
   0x1   :  { %v14_v0 = vld [vmem:[%s461_s0 + $0x10] sm:$0xff]  ;;  %v12_v1 = vld [vmem:[%s461_s0] sm:$0xff]  ;;  %v15_v2 = vld [vmem:[%s461_s0 + $0x18] sm:$0xff]  ;;  %295 = vset.pattern.permute.xlu1 %v368_v4  ;;  %294 = vset.pattern.permute.xlu0 %v368_v4 }
   0x2   :  { %32 = vmax.xlane.f32.xlu1 %v14_v0  ;;  %28 = vmax.xlane.f32.xlu0 %v12_v1  ;;  %v13_v3 = vld [vmem:[%s461_s0 + $0x8] sm:$0xff] }
   0x6   :  { %34 = vmax.xlane.f32.xlu1 %v15_v2  ;;  %30 = vmax.xlane.f32.xlu0 %v13_v3 }
   0x7   :  { %7 = vsyncpa [#allocation3], 0  ;;  %v17_v5 = vld [vmem:[%s461_s0 + $0x28] sm:$0xff]  ;;  %v16_v6 = vld [vmem:[%s461_s0 + $0x20] sm:$0xff]  ;;  %v100_v46 = vlaneseq  ;;  %vm249_vm8 = vcmask 7168  }
   0x8   :  { %v19_v7 = vld [vmem:[%s461_s0 + $0x38] sm:$0xff]  ;;  %v18_v8 = vld [vmem:[%s461_s0 + $0x30] sm:$0xff]  ;;  %v21_v9 = vld [vmem:[%s462_s1 + $0x8] sm:$0xff] }
   0x9   :  { %v22_v10 = vld [vmem:[%s462_s1 + $0x10] sm:$0xff]  ;;  %v20_v11 = vld [vmem:[%s462_s1] sm:$0xff]  ;;  %v23_v12 = vld [vmem:[%s462_s1 + $0x18] sm:$0xff]  ;;  %v101_v50 = vand.u32 127, %v100_v46 }
   0xa   :  { %38 = vmax.xlane.f32.xlu1 %v17_v5  ;;  %36 = vmax.xlane.f32.xlu0 %v16_v6  ;;  %v24_v13 = vld [vmem:[%s462_s1 + $0x20] sm:$0xff]  ;;  %v25_v14 = vld [vmem:[%s462_s1 + $0x28] sm:$0xff]  ;;  %v26_v15 = vld [vmem:[%s462_s1 + $0x30] sm:$0xff] }
   0xb   :  { %v27_v16 = vld [vmem:[%s462_s1 + $0x38] sm:$0xff]  ;;  %s369_s1 = smov [#allocation2]  }
   0xc   :  { %s282_s12 = sshll.u32 %s369_s1, 4  ;;  %s283_s12 = int_to_ptr.vmem [resolvable:$true] %s282_s12 }
   0xd   :  { %s344_s14 = scalar_lea.vmem %s283_s12, 16  ;;  %s348_s15 = scalar_lea.vmem %s283_s12, 32 }
   0xe   :  { %42 = vmax.xlane.f32.xlu1 %v19_v7  ;;  %40 = vmax.xlane.f32.xlu0 %v18_v8  ;;  %p345_p0 = scmp.ne.s32.totalorder %s283_s12, %s344_s14  ;;  %p349_p1 = scmp.lt.s32.totalorder %s283_s12, %s283_s12 }
   0xf   :  { %p350_p2 = scmp.lt.s32.totalorder %s348_s15, %s344_s14 }
  0x11   :  { %p351_p3 = por %p350_p2, %p349_p1 }
  0x13   :  { %p352_p4 = pnand %p351_p3, %p345_p0 }
  0x1f   :  { %106 = vperm.xlu1 %295, %v21_v9  }
  0x23   :  { %109 = vperm.xlu1 %295, %v22_v10  }
  0x24   :  { %103 = vperm.xlu0 %294, %v20_v11  }
  0x27   :  { %112 = vperm.xlu1 %295, %v23_v12  }
  0x2b   :  { %115 = vperm.xlu1 %295, %v24_v13  }
  0x2f   :  { %118 = vperm.xlu1 %295, %v25_v14  }
  0x33   :  { %121 = vperm.xlu1 %295, %v26_v15  }
  0x37   :  { %124 = vperm.xlu1 %295, %v27_v16  }
  0x8f   :  { %v33_v17 = vpop.xlane.xlu1 %32  ;;  %v29_v18 = vpop.xlane.xlu0 %28 }
  0x90   :  { %v44_v19 = vsub.f32 %v12_v1, %v29_v18  ;;  %v46_v25 = vsub.f32 %v14_v0, %v33_v17 }
  0x92   :  { %v52_v20 = vmul.f32 1.442695, %v44_v19  ;;  %v56_v32 = vmul.f32 1.442695, %v46_v25 }
  0x93   :  { %v35_v21 = vpop.xlane.xlu1 %34  ;;  %v31_v22 = vpop.xlane.xlu0 %30 }
  0x94   :  { %v47_v23 = vsub.f32 %v15_v2, %v35_v21  ;;  %v45_v24 = vsub.f32 %v13_v3, %v31_v22  ;;  %296 = vpow2.f32 %v52_v20 }
  0x96   :  { %v58_v26 = vmul.f32 1.442695, %v47_v23  ;;  %v54_v27 = vmul.f32 1.442695, %v45_v24 }
  0x97   :  { %v39_v28 = vpop.xlane.xlu1 %38  ;;  %v37_v29 = vpop.xlane.xlu0 %36 }
  0x98   :  { %298 = vpow2.f32 %v58_v26  ;;  %v49_v30 = vsub.f32 %v17_v5, %v39_v28  ;;  %v48_v31 = vsub.f32 %v16_v6, %v37_v29 }
  0x99   :  { %300 = vpow2.f32 %v54_v27 }
  0x9a   :  { %v62_v33 = vmul.f32 1.442695, %v49_v30  ;;  %v60_v35 = vmul.f32 1.442695, %v48_v31 }
  0x9b   :  { %v43_v34 = vpop.xlane.xlu1 %42  ;;  %v41_v36 = vpop.xlane.xlu0 %40 }
  0x9c   :  { %302 = vpow2.f32 %v62_v33  ;;  %v51_v37 = vsub.f32 %v19_v7, %v43_v34  ;;  %v50_v38 = vsub.f32 %v18_v8, %v41_v36 }
  0x9d   :  { %304 = vpow2.f32 %v56_v32 }
  0x9e   :  { %v66_v39 = vmul.f32 1.442695, %v51_v37  ;;  %v297_v40 = vpop.eup %296  ;;  %306 = vpow2.f32 %v60_v35  ;;  %v64_v42 = vmul.f32 1.442695, %v50_v38 }
  0x9f   :  { %v107_v41 = vpop.permute.xlu1 %106  ;;  %68 = vadd.xlane.f32.xlu1 %v297_v40 }
  0xa0   :  { %308 = vpow2.f32 %v66_v39  ;;  %vm127_vm0 = vcmp.eq.s32.totalorder %v101_v50, %v107_v41 }
  0xa1   :  { %310 = vpow2.f32 %v64_v42  ;;  %v135_v57 = vsel %vm127_vm0, %v45_v24, 0.0 }
  0xa2   :  { %v299_v43 = vpop.eup %298 }
  0xa3   :  { %v301_v44 = vpop.eup %300  ;;  %v110_v45 = vpop.permute.xlu1 %109  ;;  %74 = vadd.xlane.f32.xlu1 %v299_v43 }
  0xa4   :  { %70 = vadd.xlane.f32.xlu0 %v301_v44  ;;  %v104_v55 = vpop.permute.xlu0 %103  ;;  %vm128_vm3 = vcmp.eq.s32.totalorder %v101_v50, %v110_v45 }
  0xa5   :  { %vm126_vm1 = vcmp.eq.s32.totalorder %v101_v50, %v104_v55  ;;  %v136_v63 = vsel %vm128_vm3, %v46_v25, 0.0 }
  0xa6   :  { %v303_v47 = vpop.eup %302  ;;  %v134_v60 = vsel %vm126_vm1, %v44_v19, 0.0 }
  0xa7   :  { %v305_v48 = vpop.eup %304  ;;  %v113_v49 = vpop.permute.xlu1 %112  ;;  %78 = vadd.xlane.f32.xlu1 %v303_v47 }
  0xa8   :  { %72 = vadd.xlane.f32.xlu0 %v305_v48  ;;  %v307_v51 = vpop.eup %306  ;;  %vm129_vm2 = vcmp.eq.s32.totalorder %v101_v50, %v113_v49 }
  0xa9   :  { %v137_v59 = vsel %vm129_vm2, %v47_v23, 0.0 }
  0xaa   :  { %v309_v52 = vpop.eup %308 }
  0xab   :  { %v116_v53 = vpop.permute.xlu1 %115  ;;  %82 = vadd.xlane.f32.xlu1 %v309_v52  ;;  %v311_v54 = vpop.eup %310 }
  0xac   :  { %76 = vadd.xlane.f32.xlu0 %v307_v51  ;;  %vm130_vm5 = vcmp.eq.s32.totalorder %v101_v50, %v116_v53 }
  0xad   :  { %v138_v1 = vsel %vm130_vm5, %v48_v31, 0.0 }
  0xaf   :  { %v119_v56 = vpop.permute.xlu1 %118  ;;  %144 = vadd.xlane.f32.xlu1 %v135_v57 }
  0xb0   :  { %80 = vadd.xlane.f32.xlu0 %v311_v54  ;;  %vm131_vm4 = vcmp.eq.s32.totalorder %v101_v50, %v119_v56 }
  0xb1   :  { %v139_v62 = vsel %vm131_vm4, %v49_v30, 0.0 }
  0xb3   :  { %v122_v58 = vpop.permute.xlu1 %121  ;;  %148 = vadd.xlane.f32.xlu1 %v137_v59 }
  0xb4   :  { %142 = vadd.xlane.f32.xlu0 %v134_v60  ;;  %vm132_vm7 = vcmp.eq.s32.totalorder %v101_v50, %v122_v58 }
  0xb5   :  { %v140_v2 = vsel %vm132_vm7, %v50_v38, 0.0 }
  0xb7   :  { %v125_v61 = vpop.permute.xlu1 %124  ;;  %152 = vadd.xlane.f32.xlu1 %v139_v62 }
  0xb8   :  { %vm133_vm6 = vcmp.eq.s32.totalorder %v101_v50, %v125_v61  ;;  %146 = vadd.xlane.f32.xlu0 %v136_v63 }
  0xb9   :  { %v141_v0 = vsel %vm133_vm6, %v51_v37, 0.0 }
  0xbb   :  { %156 = vadd.xlane.f32.xlu1 %v141_v0 }
  0xbc   :  { %150 = vadd.xlane.f32.xlu0 %v138_v1 }
  0xc0   :  { %154 = vadd.xlane.f32.xlu0 %v140_v2 }
 0x12c   :  { %v69_v3 = vpop.xlane.xlu1 %68 }
 0x12d   :  { %312 = vlog2.f32 %v69_v3 }
 0x130   :  { %v75_v4 = vpop.xlane.xlu1 %74 }
 0x131   :  { %v71_v5 = vpop.xlane.xlu0 %70  ;;  %314 = vlog2.f32 %v75_v4 }
 0x132   :  { %316 = vlog2.f32 %v71_v5 }
 0x134   :  { %v79_v6 = vpop.xlane.xlu1 %78 }
 0x135   :  { %v73_v7 = vpop.xlane.xlu0 %72  ;;  %318 = vlog2.f32 %v79_v6 }
 0x136   :  { %320 = vlog2.f32 %v73_v7 }
 0x137   :  { %v313_v10 = vpop.eup %312 }
 0x138   :  { %v83_v8 = vpop.xlane.xlu1 %82  ;;  %v85_v19 = vmul.f32 0.6931472, %v313_v10 }
 0x139   :  { %v77_v9 = vpop.xlane.xlu0 %76  ;;  %322 = vlog2.f32 %v83_v8 }
 0x13a   :  { %324 = vlog2.f32 %v77_v9 }
 0x13b   :  { %v315_v11 = vpop.eup %314 }
 0x13c   :  { %v317_v12 = vpop.eup %316  ;;  %v145_v13 = vpop.xlane.xlu1 %144  ;;  %v91_v16 = vmul.f32 0.6931472, %v315_v11 }
 0x13d   :  { %v81_v14 = vpop.xlane.xlu0 %80  ;;  %v87_v15 = vmul.f32 0.6931472, %v317_v12 }
 0x13e   :  { %326 = vlog2.f32 %v81_v14 }
 0x13f   :  { %v319_v17 = vpop.eup %318  ;;  %v159_v18 = vsub.f32 %v145_v13, %v87_v15 }
 0x140   :  { %v321_v20 = vpop.eup %320  ;;  %v149_v21 = vpop.xlane.xlu1 %148  ;;  %v95_v26 = vmul.f32 0.6931472, %v319_v17 }
 0x141   :  { %v143_v22 = vpop.xlane.xlu0 %142  ;;  %v168_v23 = vmul.f32 1.442695, %v159_v18  ;;  %v433_v24 = vsub.f32 %v149_v21, %v91_v16  ;;  %v89_v30 = vmul.f32 0.6931472, %v321_v20 }
 0x142   :  { %v158_v25 = vsub.f32 %v143_v22, %v85_v19 }
 0x143   :  { %v323_v27 = vpop.eup %322  ;;  %328 = vpow2.f32 %v168_v23  ;;  %v172_v28 = vmul.f32 1.442695, %v433_v24 }
 0x144   :  { %v166_v29 = vmul.f32 1.442695, %v158_v25  ;;  %v325_v31 = vpop.eup %324  ;;  %v153_v32 = vpop.xlane.xlu1 %152  ;;  %v99_v36 = vmul.f32 0.6931472, %v323_v27 }
 0x145   :  { %v147_v33 = vpop.xlane.xlu0 %146  ;;  %330 = vpow2.f32 %v172_v28  ;;  %v436_v34 = vsub.f32 %v153_v32, %v95_v26  ;;  %v93_v39 = vmul.f32 0.6931472, %v325_v31 }
 0x146   :  { %v160_v35 = vsub.f32 %v147_v33, %v89_v30  ;;  %332 = vpow2.f32 %v166_v29 }
 0x147   :  { %v176_v37 = vmul.f32 1.442695, %v436_v34 }
 0x148   :  { %v170_v38 = vmul.f32 1.442695, %v160_v35  ;;  %v327_v40 = vpop.eup %326  ;;  %v157_v41 = vpop.xlane.xlu1 %156 }
 0x149   :  { %v151_v42 = vpop.xlane.xlu0 %150  ;;  %334 = vpow2.f32 %v176_v37  ;;  %v165_v43 = vsub.f32 %v157_v41, %v99_v36  ;;  %v97_v47 = vmul.f32 0.6931472, %v327_v40 }
 0x14a   :  { %v162_v44 = vsub.f32 %v151_v42, %v93_v39  ;;  %336 = vpow2.f32 %v170_v38 }
 0x14b   :  { %v180_v45 = vmul.f32 1.442695, %v165_v43 }
 0x14c   :  { %v174_v46 = vmul.f32 1.442695, %v162_v44 }
 0x14d   :  { %v155_v48 = vpop.xlane.xlu0 %154  ;;  %v329_v49 = vpop.eup %328  ;;  %338 = vpow2.f32 %v180_v45 }
 0x14e   :  { %v164_v50 = vsub.f32 %v155_v48, %v97_v47  ;;  %v183_v51 = vsub.f32 1.0, %v329_v49  ;;  %340 = vpow2.f32 %v174_v46 }
 0x14f   :  { %v331_v52 = vpop.eup %330 }
 0x150   :  { %v178_v53 = vmul.f32 1.442695, %v164_v50  ;;  %v333_v54 = vpop.eup %332  ;;  %v191_v55 = vmul.f32 %v183_v51, %v183_v51  ;;  %v185_v56 = vsub.f32 1.0, %v331_v52 }
 0x151   :  { %v182_v57 = vsub.f32 1.0, %v333_v54 }
 0x152   :  { %342 = vpow2.f32 %v178_v53  ;;  %v199_v58 = vmul.f32 -0.25, %v191_v55  ;;  %v193_v59 = vmul.f32 %v185_v56, %v185_v56 }
 0x153   :  { %v335_v60 = vpop.eup %334  ;;  %v190_v61 = vmul.f32 %v182_v57, %v182_v57 }
 0x154   :  { %v337_v62 = vpop.eup %336  ;;  %v187_v63 = vsub.f32 1.0, %v335_v60  ;;  %v207_v2 = vmul.f32 %v199_v58, %v159_v18  ;;  %v201_v3 = vmul.f32 -0.25, %v193_v59 }
 0x155   :  { %v198_v0 = vmul.f32 -0.25, %v190_v61  ;;  %v184_v1 = vsub.f32 1.0, %v337_v62 }
 0x156   :  { %v195_v6 = vmul.f32 %v187_v63, %v187_v63  ;;  %v251_v13 = vsel %vm249_vm8, %v207_v2, 0.0  ;;  %v209_v14 = vmul.f32 %v201_v3, %v433_v24 }
 0x157   :  { %v339_v4 = vpop.eup %338  ;;  %v206_v5 = vmul.f32 %v198_v0, %v158_v25  ;;  %v192_v7 = vmul.f32 %v184_v1, %v184_v1 }
 0x158   :  { %v341_v8 = vpop.eup %340  ;;  %v189_v9 = vsub.f32 1.0, %v339_v4  ;;  %v203_v16 = vmul.f32 -0.25, %v195_v6  ;;  %v255_v27 = vsel %vm249_vm8, %v209_v14, 0.0 }
 0x159   :  { %v250_v10 = vsel %vm249_vm8, %v206_v5, 0.0  ;;  %v200_v11 = vmul.f32 -0.25, %v192_v7  ;;  %v186_v12 = vsub.f32 1.0, %v341_v8 }
 0x15a   :  { %v197_v18 = vmul.f32 %v189_v9, %v189_v9  ;;  %v252_v20 = vadd.f32 %v251_v13, %v250_v10  ;;  %v211_v28 = vmul.f32 %v203_v16, %v436_v34 }
 0x15b   :  { %v208_v17 = vmul.f32 %v200_v11, %v160_v35  ;;  %v194_v19 = vmul.f32 %v186_v12, %v186_v12 }
 0x15c   :  { %v343_v15 = vpop.eup %342  ;;  %v205_v29 = vmul.f32 -0.25, %v197_v18  ;;  %v259_v36 = vsel %vm249_vm8, %v211_v28, 0.0 }
 0x15d   :  { %v188_v21 = vsub.f32 1.0, %v343_v15  ;;  %v253_v22 = vsel %vm249_vm8, %v208_v17, 0.0  ;;  %v202_v23 = vmul.f32 -0.25, %v194_v19 }
 0x15e   :  { %v254_v25 = vadd.f32 %v253_v22, %v252_v20  ;;  %v213_v37 = vmul.f32 %v205_v29, %v165_v43 }
 0x15f   :  { %v196_v26 = vmul.f32 %v188_v21, %v188_v21  ;;  %v210_v30 = vmul.f32 %v202_v23, %v162_v44 }
 0x160   :  { %v256_v31 = vadd.f32 %v255_v27, %v254_v25  ;;  %v263_v41 = vsel %vm249_vm8, %v213_v37, 0.0 }
 0x161   :  { %v204_v24 = vmul.f32 -0.25, %v196_v26  ;;  %v257_v32 = vsel %vm249_vm8, %v210_v30, 0.0 }
 0x162   :  { %v258_v33 = vadd.f32 %v257_v32, %v256_v31 }
 0x163   :  { %v212_v35 = vmul.f32 %v204_v24, %v164_v50 }
 0x164   :  { %v260_v38 = vadd.f32 %v259_v36, %v258_v33 }
 0x165   :  { %v261_v39 = vsel %vm249_vm8, %v212_v35, 0.0 }
 0x166   :  { %v262_v40 = vadd.f32 %v261_v39, %v260_v38 }
 0x168   :  { %v264_v42 = vadd.f32 %v263_v41, %v262_v40 }
 0x16a   :  { %265 = vadd.xlane.f32.xlu0 %v264_v42 }
 0x1f7   :  { %v266_v34 = vpop.xlane.xlu0 %265 }
 0x1f8   :  { %v267_v45 = vrot.slane %v266_v34, 4 }
 0x1fa   :  { %v268_v44 = vadd.f32 %v267_v45, %v266_v34 }
 0x1fc   :  { %v269_v46 = vrot.slane %v268_v44, 2 }
 0x1fe   :  { %v270_v47 = vadd.f32 %v269_v46, %v268_v44 }
 0x200   :  { %v271_v48 = vrot.slane %v270_v47, 1 }
 0x202   :  { %v272_v49 = vadd.f32 %v271_v48, %v270_v47 }
 0x204   :  { %290 = vpush %v272_v49 }
 0x235   :  { %s291_s13 = spop %290 }
 0x236   :  { %v274_v43 = vstv %s291_s13 }
 0x237   :  { %275 = vst [vmem:[#allocation2] sm:$0x1] %v274_v43 }
 0x238   :  { %355 = shalt.err (!%p352_p4)
}
 0x239   :  { %s356_s18 = scalar_lea.hbm %s463_s2, 16 }
 0x23a   :  { %p357_p5 = scmp.ne.s32.totalorder %s463_s2, %s356_s18  ;;  %p360_p6 = scmp.lt.u32.totalorder %s356_s18, %s463_s2 }
 0x23c   :  { %p362_p7 = pnand %p360_p6, %p357_p5 }
 0x23e   :  { %365 = shalt.err (!%p362_p7)
}
 0x23f   :  { %285 = dma.vmem_to_hbm [thread:$0]  %s283_s12, 16, %s463_s2, [#allocation3]  }
 0x240   :  { %366 = dma.done.wait [#allocation3], 16  }
 0x241   :  { %367 = vsyncadd [#allocation3], 4294967280 }
 0x242   :  { %289 = vsyncpa [#allocation3], 1 }

</bundles_post_ra>
